<compile_context>
chip_gen: v7x
topology: tpu7x:2x2x1
jax: 0.10.0
libtpu: 0.0.40
codegen_flags: <defaults>
</compile_context>

<pallas_src>
from functools import partial
from typing import NamedTuple, List

import jax
import jax.numpy as jnp
from jax.experimental import pallas as pl
from jax.experimental.pallas import tpu as pltpu


# ----------------------------- graph containers ----------------------------

class EdgeSet(NamedTuple):
    name: str
    features: jnp.ndarray

    def _replace_features(self, features):
        return EdgeSet(self.name, features)


class MultiGraph(NamedTuple):
    node_features: List[jnp.ndarray]
    edge_sets: List[EdgeSet]


# --------------------------------- helpers ----------------------------------

def _round_up(x, m):
    return (x + m - 1) // m * m


def _cdiv(a, b):
    return (a + b - 1) // b


def _choose_row_tile(total_rows, max_tm=512, min_steps=4):
    # Multiple of 128 (whole-vreg output tiles), as large as possible while
    # keeping >= ~min_steps grid steps so the v7x megacore split stays busy.
    tm = _round_up(max(_cdiv(total_rows, min_steps), 1), 128)
    return int(max(128, min(max_tm, tm)))


# ------------------------------- Pallas kernel ------------------------------

def _grouped_mlp_ln_kernel(gid_ref, x_ref, w1_ref, w2_ref, vec_ref, o_ref):
    # gid_ref (SMEM scalar-prefetch) is only consumed by the index_maps.
    del gid_ref

    x = x_ref[...]                                   # (tm, dmax) f32
    vec = vec_ref[0]                                 # (4, L) f32
    b1, b2 = vec[0:1], vec[1:2]                      # (1, L)
    gamma, beta = vec[2:3], vec[3:4]                 # (1, L)

    # Linear 1 (bf16 MXU operands, f32 accumulation) + bias + ReLU in f32.
    h = jnp.dot(x.astype(jnp.bfloat16), w1_ref[0],
                preferred_element_type=jnp.float32)
    h = jnp.maximum(h + b1, 0.0)

    # Linear 2 (bf16 MXU operands, f32 accumulation) + bias.
    y = jnp.dot(h.astype(jnp.bfloat16), w2_ref[0],
                preferred_element_type=jnp.float32)
    y = y + b2

    # LayerNorm over the feature axis, two-pass variance, f32 math.
    mean = jnp.mean(y, axis=-1, keepdims=True)
    yc = y - mean
    var = jnp.mean(yc * yc, axis=-1, keepdims=True)
    y_hat = yc * jax.lax.rsqrt(var + 1e-5)

    o_ref[...] = (y_hat * gamma + beta).astype(o_ref.dtype)


# --------------------------- fused grouped forward ---------------------------

@partial(jax.jit, static_argnames=("tm",))
def _fused_encode(feats, group_ids, w1_all, w2_all, vec_all, *, tm):
    """Apply per-group (Linear->ReLU->Linear->LayerNorm) to a tuple of row
    matrices in ONE pallas_call.  Weights are pre-stacked/padded (see
    Encoder.__init__)."""
    dmax = w1_all.shape[1]
    latent = w2_all.shape[2]

    # Pad every group's rows to a multiple of tm (so no tile straddles two
    # groups) and its feature dim to dmax, then concatenate along rows.
    xs, padded = [], []
    for x in feats:
        n, d = x.shape
        n_pad = _round_up(n, tm)
        xs.append(jnp.pad(x.astype(jnp.float32),
                          ((0, n_pad - n), (0, dmax - d))))
        padded.append(n_pad)
    x_all = jnp.concatenate(xs, axis=0)              # (Ntot_pad, dmax)
    n_tiles = x_all.shape[0] // tm

    row_map = lambda i, gid: (i, 0)
    wt_map = lambda i, gid: (gid[i], 0, 0)   # same gid across consecutive
                                             # tiles => weight stays in VMEM

    out = pl.pallas_call(
        _grouped_mlp_ln_kernel,
        out_shape=jax.ShapeDtypeStruct((x_all.shape[0], latent), jnp.float32),
        grid_spec=pltpu.PrefetchScalarGridSpec(
            num_scalar_prefetch=1,
            grid=(n_tiles,),
            in_specs=[
                pl.BlockSpec((tm, dmax), row_map),            # x row tile
                pl.BlockSpec((1, dmax, latent), wt_map),      # W1 (bf16)
                pl.BlockSpec((1, latent, latent), wt_map),    # W2 (bf16)
                pl.BlockSpec((1, 4, latent), wt_map),         # b1,b2,gamma,beta
            ],
            out_specs=pl.BlockSpec((tm, latent), row_map),
        ),
        compiler_params=pltpu.CompilerParams(
            dimension_semantics=("parallel",)),
    )(group_ids, x_all, w1_all, w2_all, vec_all)

    # Slice each group's (unpadded) rows back out.
    results, off = [], 0
    for x, n_pad in zip(feats, padded):
        results.append(out[off:off + x.shape[0]])
        off += n_pad
    return results


# ------------------------------ parameter setup -----------------------------

def make_mlp_params(key, in_dim, latent_size):
    """Deterministic synthetic params for Linear->ReLU->Linear->LayerNorm."""
    k1, k2 = jax.random.split(key)
    s1 = 1.0 / jnp.sqrt(jnp.float32(in_dim))
    s2 = 1.0 / jnp.sqrt(jnp.float32(latent_size))
    w1 = jax.random.uniform(k1, (in_dim, latent_size), jnp.float32, -s1, s1)
    b1 = jnp.zeros((1, latent_size), jnp.float32)
    w2 = jax.random.uniform(k2, (latent_size, latent_size), jnp.float32, -s2, s2)
    b2 = jnp.zeros((1, latent_size), jnp.float32)
    gamma = jnp.ones((1, latent_size), jnp.float32)
    beta = jnp.zeros((1, latent_size), jnp.float32)
    return (w1, b1, w2, b2, gamma, beta)


# --------------------------------- Encoder ----------------------------------

class Encoder:
    """Encodes node and edge features into latent features (Pallas-backed)."""

    def __init__(self, key, latent_size, edge_sets, node_in_dim,
                 hyper_node_in_dim, edge_in_dims, hierarchical=True):
        keys = jax.random.split(key, 2 + len(edge_sets))
        self._latent_size = latent_size
        self.hierarchical = hierarchical

        # f32 per-model params (kept for reference / inspection).
        self.node_model = make_mlp_params(keys[0], node_in_dim, latent_size)
        self.edge_models = {
            name: make_mlp_params(keys[2 + i], edge_in_dims[name], latent_size)
            for i, name in enumerate(edge_sets)
        }
        if hierarchical:
            self.hyper_node_model = make_mlp_params(
                keys[1], hyper_node_in_dim, latent_size)

        # ---- canonical kernel parameter format: stacked & padded, built ONCE.
        groups = [self.node_model]
        self._gid_node = 0
        if hierarchical:
            groups.append(self.hyper_node_model)
            self._gid_hyper = 1
        else:
            self._gid_hyper = None
        self._gid_edges = {}
        for name in edge_sets:
            self._gid_edges[name] = len(groups)
            groups.append(self.edge_models[name])

        in_dims = [node_in_dim, hyper_node_in_dim] + list(edge_in_dims.values())
        self._dmax = _round_up(max(in_dims), 8)

        # W1 rows padded to dmax with zeros (padded x columns are zero -> exact).
        self.w1_all = jnp.stack(
            [jnp.pad(p[0], ((0, self._dmax - p[0].shape[0]), (0, 0)))
             for p in groups]).astype(jnp.bfloat16)            # (G, dmax, L)
        self.w2_all = jnp.stack(
            [p[2] for p in groups]).astype(jnp.bfloat16)       # (G, L, L)
        # b1, b2, gamma, beta packed into one (G, 4, L) f32 array.
        self.vec_all = jnp.stack(
            [jnp.concatenate([p[1], p[3], p[4], p[5]], axis=0)
             for p in groups]).astype(jnp.float32)             # (G, 4, L)

    def __call__(self, graph: MultiGraph) -> MultiGraph:
        # Gather every (features, group-id) pair, run ONE fused Pallas call,
        # then scatter the results back into the MultiGraph structure.
        feats, gids, tags = [], [], []

        feats.append(graph.node_features[0])
        gids.append(self._gid_node)
        tags.append(("node", None))

        if len(graph.node_features) > 1 and graph.node_features[1] is not None:
            # hierarchical=False mirrors torch's node_model-on-hyper-features
            # path; with mismatched input dims it only "works" via the dmax
            # zero column padding (torch would raise a shape error).
            feats.append(graph.node_features[1])
            gids.append(self._gid_hyper if self.hierarchical else self._gid_node)
            tags.append(("node", None))

        for edge_set in graph.edge_sets:
            if edge_set.name not in self._gid_edges:   # mirrors KeyError: continue
                continue
            feats.append(edge_set.features)
            gids.append(self._gid_edges[edge_set.name])
            tags.append(("edge", edge_set))

        total = sum(int(f.shape[0]) for f in feats)
        tm = _choose_row_tile(total)

        # Per-tile group ids (shapes are static -> cheap Python).
        tile_gids = []
        for f, g in zip(feats, gids):
            tile_gids.extend([g] * (_round_up(int(f.shape[0]), tm) // tm))
        group_ids = jnp.asarray(tile_gids, dtype=jnp.int32)

        outs = _fused_encode(tuple(feats), group_ids,
                             self.w1_all, self.w2_all, self.vec_all, tm=tm)

        node_latents, new_edge_sets = [], []
        for (kind, es), latent in zip(tags, outs):
            if kind == "node":
                node_latents.append(latent)
            else:
                new_edge_sets.append(es._replace_features(latent))
        return MultiGraph(node_latents, new_edge_sets)


# -------------------------------- reference ---------------------------------

def _mlp_ref(x, params):
    w1, b1, w2, b2, gamma, beta = params
    h = jnp.maximum(x @ w1 + b1, 0.0)
    y = h @ w2 + b2
    mean = jnp.mean(y, axis=-1, keepdims=True)
    var = jnp.mean((y - mean) ** 2, axis=-1, keepdims=True)
    return (y - mean) * jax.lax.rsqrt(var + 1e-5) * gamma + beta


# ----------------------------------- main ------------------------------------

if __name__ == "__main__":
    key = jax.random.PRNGKey(0)
    k_params, k_n0, k_n1, k_e0, k_e1 = jax.random.split(key, 5)

    latent_size = 128          # canonical MeshGraphNets width -> lane-dense output
    node_in_dim = 12
    hyper_node_in_dim = 9
    edge_in_dims = {"mesh_edges": 7, "world_edges": 4}

    # arbitrary (non-multiple-of-8) row counts: wrapper pads/unpads internally
    node_feats = jax.random.normal(k_n0, (200, node_in_dim), jnp.float32)
    hyper_node_feats = jax.random.normal(k_n1, (48, hyper_node_in_dim), jnp.float32)
    mesh_edge_feats = jax.random.normal(k_e0, (520, edge_in_dims["mesh_edges"]), jnp.float32)
    world_edge_feats = jax.random.normal(k_e1, (130, edge_in_dims["world_edges"]), jnp.float32)

    graph = MultiGraph(
        node_features=[node_feats, hyper_node_feats],
        edge_sets=[
            EdgeSet("mesh_edges", mesh_edge_feats),
            EdgeSet("world_edges", world_edge_feats),
            EdgeSet("unknown_edges", mesh_edge_feats),  # no model -> skipped
        ],
    )

    encoder = Encoder(k_params, latent_size,
                      edge_sets=["mesh_edges", "world_edges"],
                      node_in_dim=node_in_dim,
                      hyper_node_in_dim=hyper_node_in_dim,
                      edge_in_dims=edge_in_dims,
                      hierarchical=True)

    out = encoder(graph)
    jax.block_until_ready((out.node_features,
                           [es.features for es in out.edge_sets]))

    # correctness check against pure-JAX f32 reference (bf16 MXU operands ->
    # relaxed tolerance)
    ref_n0 = _mlp_ref(node_feats, encoder.node_model)
    ref_n1 = _mlp_ref(hyper_node_feats, encoder.hyper_node_model)
    ref_e0 = _mlp_ref(mesh_edge_feats, encoder.edge_models["mesh_edges"])
    ref_e1 = _mlp_ref(world_edge_feats, encoder.edge_models["world_edges"])

    assert out.node_features[0].shape == (200, latent_size)
    assert out.node_features[1].shape == (48, latent_size)
    assert len(out.edge_sets) == 2  # unknown edge set was skipped
    assert out.edge_sets[0].name == "mesh_edges"
    assert out.edge_sets[1].name == "world_edges"
    assert jnp.allclose(out.node_features[0], ref_n0, atol=5e-2)
    assert jnp.allclose(out.node_features[1], ref_n1, atol=5e-2)
    assert jnp.allclose(out.edge_sets[0].features, ref_e0, atol=5e-2)
    assert jnp.allclose(out.edge_sets[1].features, ref_e1, atol=5e-2)

    print("KERNEL_OK")
</pallas_src>

<mosaic_0001>
module attributes {stable_mosaic.version = 11 : i64} {
  func.func @_grouped_mlp_ln_kernel(%arg0: i32, %arg1: memref<6xi32, #tpu.memory_space<smem>>, %arg2: memref<256x16xf32, #tpu.memory_space<vmem>>, %arg3: memref<1x16x128xbf16, #tpu.memory_space<vmem>>, %arg4: memref<1x128x128xbf16, #tpu.memory_space<vmem>>, %arg5: memref<1x4x128xf32, #tpu.memory_space<vmem>>, %arg6: memref<256x128xf32, #tpu.memory_space<vmem>>) attributes {dimension_semantics = [#tpu.dimension_semantics<parallel>], iteration_bounds = array<i64: 6>, scalar_prefetch = 1 : i64, scratch_operands = 0 : i64, tpu.core_type = #tpu.core_type<tc>, window_params = [{transform_indices = @transform_0, window_bounds = array<i64: 256, 16>}, {transform_indices = @transform_1, window_bounds = array<i64: 1, 16, 128>}, {transform_indices = @transform_2, window_bounds = array<i64: 1, 128, 128>}, {transform_indices = @transform_3, window_bounds = array<i64: 1, 4, 128>}, {transform_indices = @transform_4, window_bounds = array<i64: 256, 128>}]} {
    %c0 = arith.constant 0 : index
    %c0_0 = arith.constant 0 : index
    %0 = vector.load %arg2[%c0, %c0_0] : memref<256x16xf32, #tpu.memory_space<vmem>>, vector<256x16xf32>
    %c0_1 = arith.constant 0 : index
    %c0_2 = arith.constant 0 : index
    %c0_3 = arith.constant 0 : index
    %1 = vector.load %arg5[%c0_1, %c0_2, %c0_3] : memref<1x4x128xf32, #tpu.memory_space<vmem>>, vector<1x4x128xf32>
    %2 = vector.shape_cast %1 : vector<1x4x128xf32> to vector<4x128xf32>
    %3 = vector.extract_strided_slice %2 {offsets = [0, 0], sizes = [1, 128], strides = [1, 1]} : vector<4x128xf32> to vector<1x128xf32>
    %4 = vector.extract_strided_slice %2 {offsets = [1, 0], sizes = [1, 128], strides = [1, 1]} : vector<4x128xf32> to vector<1x128xf32>
    %5 = vector.extract_strided_slice %2 {offsets = [2, 0], sizes = [1, 128], strides = [1, 1]} : vector<4x128xf32> to vector<1x128xf32>
    %6 = vector.extract_strided_slice %2 {offsets = [3, 0], sizes = [1, 128], strides = [1, 1]} : vector<4x128xf32> to vector<1x128xf32>
    %7 = arith.truncf %0 : vector<256x16xf32> to vector<256x16xbf16>
    %c0_4 = arith.constant 0 : index
    %c0_5 = arith.constant 0 : index
    %c0_6 = arith.constant 0 : index
    %8 = vector.load %arg3[%c0_4, %c0_5, %c0_6] : memref<1x16x128xbf16, #tpu.memory_space<vmem>>, vector<1x16x128xbf16>
    %9 = vector.shape_cast %8 : vector<1x16x128xbf16> to vector<16x128xbf16>
    %cst = arith.constant dense<0.000000e+00> : vector<256x128xf32>
    %10 = tpu.matmul %7, %9, %cst {dimension_numbers = #tpu.dot_dimension_numbers<[1], [0], [0], [1], [0, 0, 1, 1], [], []>} : vector<256x16xbf16>, vector<16x128xbf16>, vector<256x128xf32> -> vector<256x128xf32>
    %11 = vector.broadcast %3 : vector<1x128xf32> to vector<256x128xf32>
    %12 = arith.addf %10, %11 : vector<256x128xf32>
    %cst_7 = arith.constant 0.000000e+00 : f32
    %13 = vector.broadcast %cst_7 : f32 to vector<256x128xf32>
    %14 = arith.maximumf %12, %13 : vector<256x128xf32>
    %15 = arith.truncf %14 : vector<256x128xf32> to vector<256x128xbf16>
    %c0_8 = arith.constant 0 : index
    %c0_9 = arith.constant 0 : index
    %c0_10 = arith.constant 0 : index
    %16 = vector.load %arg4[%c0_8, %c0_9, %c0_10] : memref<1x128x128xbf16, #tpu.memory_space<vmem>>, vector<1x128x128xbf16>
    %17 = vector.shape_cast %16 : vector<1x128x128xbf16> to vector<128x128xbf16>
    %cst_11 = arith.constant dense<0.000000e+00> : vector<256x128xf32>
    %18 = tpu.matmul %15, %17, %cst_11 {dimension_numbers = #tpu.dot_dimension_numbers<[1], [0], [0], [1], [0, 0, 1, 1], [], []>} : vector<256x128xbf16>, vector<128x128xbf16>, vector<256x128xf32> -> vector<256x128xf32>
    %19 = vector.broadcast %4 : vector<1x128xf32> to vector<256x128xf32>
    %20 = arith.addf %18, %19 : vector<256x128xf32>
    %cst_12 = arith.constant dense<0.000000e+00> : vector<256xf32>
    %21 = vector.multi_reduction <add>, %20, %cst_12 [1] : vector<256x128xf32> to vector<256xf32>
    %22 = vector.shape_cast %21 : vector<256xf32> to vector<256x1xf32>
    %cst_13 = arith.constant 1.280000e+02 : f32
    %23 = vector.broadcast %cst_13 : f32 to vector<256x1xf32>
    %24 = arith.divf %22, %23 : vector<256x1xf32>
    %25 = vector.broadcast %24 : vector<256x1xf32> to vector<256x128xf32>
    %26 = arith.subf %20, %25 : vector<256x128xf32>
    %27 = arith.mulf %26, %26 : vector<256x128xf32>
    %cst_14 = arith.constant dense<0.000000e+00> : vector<256xf32>
    %28 = vector.multi_reduction <add>, %27, %cst_14 [1] : vector<256x128xf32> to vector<256xf32>
    %29 = vector.shape_cast %28 : vector<256xf32> to vector<256x1xf32>
    %cst_15 = arith.constant 1.280000e+02 : f32
    %30 = vector.broadcast %cst_15 : f32 to vector<256x1xf32>
    %31 = arith.divf %29, %30 : vector<256x1xf32>
    %cst_16 = arith.constant 9.99999974E-6 : f32
    %32 = vector.broadcast %cst_16 : f32 to vector<256x1xf32>
    %33 = arith.addf %31, %32 : vector<256x1xf32>
    %34 = math.rsqrt %33 : vector<256x1xf32>
    %35 = vector.broadcast %34 : vector<256x1xf32> to vector<256x128xf32>
    %36 = arith.mulf %26, %35 : vector<256x128xf32>
    %37 = vector.broadcast %5 : vector<1x128xf32> to vector<256x128xf32>
    %38 = arith.mulf %36, %37 : vector<256x128xf32>
    %39 = vector.broadcast %6 : vector<1x128xf32> to vector<256x128xf32>
    %40 = arith.addf %38, %39 : vector<256x128xf32>
    %c0_17 = arith.constant 0 : index
    %c0_18 = arith.constant 0 : index
    %41 = vector.load %arg6[%c0_17, %c0_18] : memref<256x128xf32, #tpu.memory_space<vmem>>, vector<256x128xf32>
    tpu.vector_store %arg6[%c0_17, %c0_18], %40 {strides = array<i32>} : memref<256x128xf32, #tpu.memory_space<vmem>>, vector<256x128xf32>,
    return
  }
  func.func @transform_0(%arg0: i32, %arg1: memref<6xi32, #tpu.memory_space<smem>>) -> (i32, i32) {
    %c0_i32 = arith.constant 0 : i32
    %c0_i32_0 = arith.constant 0 : i32
    return %arg0, %c0_i32 : i32, i32
  }
  func.func @transform_1(%arg0: i32, %arg1: memref<6xi32, #tpu.memory_space<smem>>) -> (i32, i32, i32) {
    %0 = arith.index_cast %arg0 : i32 to index
    %1 = memref.load %arg1[%0] : memref<6xi32, #tpu.memory_space<smem>>
    %c0_i32 = arith.constant 0 : i32
    %c0_i32_0 = arith.constant 0 : i32
    %c0_i32_1 = arith.constant 0 : i32
    return %1, %c0_i32, %c0_i32_0 : i32, i32, i32
  }
  func.func @transform_2(%arg0: i32, %arg1: memref<6xi32, #tpu.memory_space<smem>>) -> (i32, i32, i32) {
    %0 = arith.index_cast %arg0 : i32 to index
    %1 = memref.load %arg1[%0] : memref<6xi32, #tpu.memory_space<smem>>
    %c0_i32 = arith.constant 0 : i32
    %c0_i32_0 = arith.constant 0 : i32
    %c0_i32_1 = arith.constant 0 : i32
    return %1, %c0_i32, %c0_i32_0 : i32, i32, i32
  }
  func.func @transform_3(%arg0: i32, %arg1: memref<6xi32, #tpu.memory_space<smem>>) -> (i32, i32, i32) {
    %0 = arith.index_cast %arg0 : i32 to index
    %1 = memref.load %arg1[%0] : memref<6xi32, #tpu.memory_space<smem>>
    %c0_i32 = arith.constant 0 : i32
    %c0_i32_0 = arith.constant 0 : i32
    %c0_i32_1 = arith.constant 0 : i32
    return %1, %c0_i32, %c0_i32_0 : i32, i32, i32
  }
  func.func @transform_4(%arg0: i32, %arg1: memref<6xi32, #tpu.memory_space<smem>>) -> (i32, i32) {
    %c0_i32 = arith.constant 0 : i32
    %c0_i32_0 = arith.constant 0 : i32
    return %arg0, %c0_i32 : i32, i32
  }
}

</mosaic_0001>

<bundles_post_ra>
// kernel: _fused_encode.1
= control target key start
LH: loop header
LB: loop body
LE: loop exit
PB: predicated region body
PF: predicated region fallthrough
CT: control target
= control target key end

     0   :  { %s2273_s0 = inlined_call_operand.vmem [shape: s32[6], index: 0, kind: input, shape index: {}]   ;;  %s2274_s1 = inlined_call_operand.vmem [shape: f32[1536,16], index: 1, kind: input, shape index: {}]   ;;  %s2275_s2 = inlined_call_operand.vmem [shape: bf16[4,16,128], index: 2, kind: input, shape index: {}]   ;;  %s2276_s3 = inlined_call_operand.vmem [shape: bf16[4,128,128], index: 3, kind: input, shape index: {}]   ;;  %s2277_s4 = inlined_call_operand.vmem [shape: f32[4,4,128], index: 4, kind: input, shape index: {}]   ;;  %s2278_s5 = inlined_call_operand.vmem [shape: f32[1536,128], index: 5, kind: output, shape index: {}]  }
   0x1   :  { %s10_s20 = sshll.u32 %s2273_s0, 4  ;;  %s11_s20 = int_to_ptr.vmem [resolvable:$true] %s10_s20 }
   0x2   :  { %s1648_s21 = scalar_lea.vmem %s11_s20, 16  ;;  %p1653_p1 = scmp.lt.s32.totalorder %s11_s20, %s11_s20 }
   0x3   :  { %p1649_p0 = scmp.ne.s32.totalorder %s11_s20, %s1648_s21  ;;  %p1654_p2 = scmp.lt.s32.totalorder %s1648_s21, %s1648_s21 }
   0x5   :  { %p1655_p3 = por %p1654_p2, %p1653_p1 }
   0x7   :  { %p1656_p4 = pnand %p1655_p3, %p1649_p0 }
   0x9   :  { %1659 = shalt.err (!%p1656_p4)  }
   0xa   :  { %s1670_s22 = smov [#allocation3]  }
   0xb   :  { %13 = dma.vmem_to_smem %s11_s20, 16, %s1670_s22, [#allocation2] }
   0xc   :  { %1664 = dma.done.wait [#allocation2], 16 }
   0xd   :  { %1665 = vsyncadd [#allocation2], 4294967280 }
   0xe   :  { %15 = sfence }
   0xf   :  { %s1704_s23 = smov 0  }
  0x10 LB: > { %s1710_s0 = sadd.s32 4294967295, %s1668_s23   ;;  %p1388_p5 = scmp.ge.s32.totalorder %s1668_s23, 1  ;;  %s1668_s23 = sphi %s1704_s23, %s21_s23  }
  0x11   : > { %p211_p6 = scmp.lt.s32.totalorder %s1668_s23, 7 }
  0x13   : > { %p212_p7 = pnand %p1388_p5, %p211_p6 }
  0x14   : > { %s260_s24 = sld [smem:[#allocation3 + %s1710_s0]] (!%p212_p7)  ;;  %s1389_s25 = sshll.u32 (!%p212_p7), %s1710_s0, 5  ;;  %vm348_vm0 = vcmask (!%p212_p7), 130048   ;;  %v338_v57 = vlaneseq (!%p212_p7) }
  0x15   : > { %215 = sbr.rel (%p212_p7) target bundleno = 850 (0x352), region = 36  ;;  %p255_p8 = scmp.lt.s32.totalorder (!%p212_p7), %s1389_s25, 191 }
  0x16   : > { %s267_s26 = sld [smem:[#allocation3 + %s1710_s0]] (!%p212_p7)  ;;  %v1792_v58 = vshrl.u32 (!%p212_p7), %v338_v57, 7 }
  0x17   : > { %s274_s14 = sld [smem:[#allocation3 + %s1710_s0]] (!%p212_p7) }
  0x18   : > { %v340_v59 = vsub.s32 (!%p212_p7), 0, %v1792_v58 }
  0x1a   : > { %p261_p9 = scmp.lt.s32.totalorder (!%p212_p7), %s260_s24, 3 }
  0x1c   : > { %s2280_s25 = smov (!%p255_p8, %s1389_s25), 191  ;;  %p268_p10 = scmp.lt.s32.totalorder %s267_s26, 3 }
  0x1d   : > { %s1390_s27 = sshll.u32 %s2280_s25, 3  ;;  %s2282_s24 = smov (!%p261_p9, %s260_s24), 3 }
  0x1e   : > { %s1725_s30 = scalar_lea.vmem %s2274_s1, %s1390_s27  ;;  %s2284_s26 = smov (!%p268_p10, %s267_s26), 3 }
  0x1f   : > { %v287_v0 = vld [vmem:[%s1725_s30] sm:$0xff]  ;;  %v288_v1 = vld [vmem:[%s1725_s30 + $0x8] sm:$0xff]  ;;  %s1425_s6 = sshll.u32 %s2282_s24, 3  ;;  %v289_v3 = vld [vmem:[%s1725_s30 + $0x10] sm:$0xff]  ;;  %s1426_s10 = sshll.u32 %s2284_s26, 6 }
  0x20   : > { %v320_v2 = vpack.c.bf16 %v288_v1, %v287_v0  ;;  %s265_s9 = scalar_lea.vmem %s2275_s2, %s1425_s6  ;;  %v290_v4 = vld [vmem:[%s1725_s30 + $0x18] sm:$0xff]  ;;  %v291_v5 = vld [vmem:[%s1725_s30 + $0x20] sm:$0xff]  ;;  %v292_v6 = vld [vmem:[%s1725_s30 + $0x28] sm:$0xff]  ;;  %s1740_s13 = scalar_lea.vmem %s2276_s3, %s1426_s10 }
  0x21   : > { %v1575_v7 = vld [vmem:[%s265_s9] sm:$0xff]   ;;  %v321_v8 = vpack.c.bf16 %v290_v4, %v289_v3  ;;  %v322_v9 = vpack.c.bf16 %v292_v6, %v291_v5  ;;  %v293_v10 = vld [vmem:[%s1725_s30 + $0x30] sm:$0xff]  ;;  %v294_v11 = vld [vmem:[%s1725_s30 + $0x38] sm:$0xff]  ;;  %p275_p11 = scmp.lt.s32.totalorder %s274_s14, 3  ;;  %s2142_s21 = scalar_lea.vmem %s2278_s5, %s1390_s27 }
  0x22   : > { %1470 = vmatprep.mubr.msk.bf16.mxu0 %vm348_vm0, %v320_v2  ;;  %1468 = vmatprep.subr.bf16.mxu0 %v1575_v7  ;;  %v295_v12 = vld [vmem:[%s1725_s30 + $0x40] sm:$0xff]  ;;  %v296_v13 = vld [vmem:[%s1725_s30 + $0x48] sm:$0xff]  ;;  %v323_v16 = vpack.c.bf16 %v294_v11, %v293_v10  ;;  %v1578_v18 = vld [vmem:[%s1740_s13 + $0x10] sm:$0xff]  }
  0x23   : > { %1469 = vmatpush3.bf16.msra.mxu0 %v1575_v7  ;;  %v1576_v14 = vld [vmem:[%s1740_s13] sm:$0xff]   ;;  %v1577_v15 = vld [vmem:[%s1740_s13 + $0x8] sm:$0xff]   ;;  %v324_v17 = vpack.c.bf16 %v296_v13, %v295_v12  ;;  %v297_v19 = vld [vmem:[%s1725_s30 + $0x50] sm:$0xff]  ;;  %s2286_s14 = smov (!%p275_p11, %s274_s14), 3 }
  0x24   : > { %1502 = vmatprep.subr.bf16.mxu0 %v1576_v14  ;;  %1550 = vmatprep.subr.bf16.mxu1 %v1576_v14  ;;  %v298_v20 = vld [vmem:[%s1725_s30 + $0x58] sm:$0xff]  ;;  %v299_v21 = vld [vmem:[%s1725_s30 + $0x60] sm:$0xff]  ;;  %v300_v22 = vld [vmem:[%s1725_s30 + $0x68] sm:$0xff]  ;;  %s1395_s15 = sshll.u32 %s2286_s14, 2 }
  0x25   : > { %1558 = vmatpush3.bf16.msra.mxu1 %v1576_v14  ;;  %v1579_v23 = vld [vmem:[%s1740_s13 + $0x18] sm:$0xff]   ;;  %v325_v24 = vpack.c.bf16 %v298_v20, %v297_v19  ;;  %v326_v25 = vpack.c.bf16 %v300_v22, %v299_v21  ;;  %v1580_v26 = vld [vmem:[%s1740_s13 + $0x20] sm:$0xff]   ;;  %v301_v27 = vld [vmem:[%s1725_s30 + $0x70] sm:$0xff]  ;;  %s278_s18 = scalar_lea.vmem %s2277_s4, %s1395_s15 }
  0x26   : > { %1471 = vmatmul.mubr.msk.bf16.vlgmr.msra.gmra.mrb[0].mxu0 %vm348_vm0, %v321_v8  ;;  %1551 = vmatprep.subr.bf16.mxu1 %v1577_v15  ;;  %v302_v28 = vld [vmem:[%s1725_s30 + $0x78] sm:$0xff]  ;;  %v303_v29 = vld [vmem:[%s1725_s30 + $0x80] sm:$0xff]  ;;  %v304_v30 = vld [vmem:[%s1725_s30 + $0x88] sm:$0xff] }
  0x27   : > { %1474 = vmatprep.mubr.msk.bf16.mxu0 %vm348_vm0, %v322_v9  ;;  %1503 = vmatpush3.bf16.msra.mxu0 %v1576_v14  ;;  %v1581_v31 = vld [vmem:[%s1740_s13 + $0x28] sm:$0xff]   ;;  %v327_v32 = vpack.c.bf16 %v302_v28, %v301_v27  ;;  %v328_v33 = vpack.c.bf16 %v304_v30, %v303_v29  ;;  %v1582_v34 = vld [vmem:[%s1740_s13 + $0x30] sm:$0xff]   ;;  %v306_v36 = vld [vmem:[%s1725_s30 + $0x98] sm:$0xff] }
  0x28   : > { %1504 = vmatprep.subr.bf16.mxu0 %v1577_v15  ;;  %v305_v35 = vld [vmem:[%s1725_s30 + $0x90] sm:$0xff]  ;;  %v307_v37 = vld [vmem:[%s1725_s30 + $0xa0] sm:$0xff]  ;;  %v308_v38 = vld [vmem:[%s1725_s30 + $0xa8] sm:$0xff] }
  0x29   : > { %1559 = vmatpush3.bf16.msra.mxu1 %v1577_v15  ;;  %v329_v39 = vpack.c.bf16 %v306_v36, %v305_v35  ;;  %v330_v40 = vpack.c.bf16 %v308_v38, %v307_v37  ;;  %v309_v41 = vld [vmem:[%s1725_s30 + $0xb0] sm:$0xff]  ;;  %v310_v42 = vld [vmem:[%s1725_s30 + $0xb8] sm:$0xff]  ;;  %v311_v43 = vld [vmem:[%s1725_s30 + $0xc0] sm:$0xff] }
  0x2a   : > { %1552 = vmatprep.subr.bf16.mxu1 %v1578_v18  ;;  %v312_v44 = vld [vmem:[%s1725_s30 + $0xc8] sm:$0xff]  ;;  %v331_v45 = vpack.c.bf16 %v310_v42, %v309_v41  ;;  %v313_v47 = vld [vmem:[%s1725_s30 + $0xd0] sm:$0xff]  ;;  %v314_v48 = vld [vmem:[%s1725_s30 + $0xd8] sm:$0xff] }
  0x2b   : > { %1505 = vmatpush3.bf16.msra.mxu0 %v1577_v15  ;;  %v332_v46 = vpack.c.bf16 %v312_v44, %v311_v43  ;;  %v315_v49 = vld [vmem:[%s1725_s30 + $0xe0] sm:$0xff]  ;;  %v316_v50 = vld [vmem:[%s1725_s30 + $0xe8] sm:$0xff]  ;;  %v333_v51 = vpack.c.bf16 %v314_v48, %v313_v47  ;;  %v317_v53 = vld [vmem:[%s1725_s30 + $0xf0] sm:$0xff] }
  0x2c   : > { %1506 = vmatprep.subr.bf16.mxu0 %v1578_v18  ;;  %v334_v52 = vpack.c.bf16 %v316_v50, %v315_v49  ;;  %v318_v54 = vld [vmem:[%s1725_s30 + $0xf8] sm:$0xff]  ;;  %v1798_v60 = vld [vmem:[%s278_s18] sm:$0xf] }
  0x2d   : > { %1560 = vmatpush3.bf16.msra.mxu1 %v1578_v18  ;;  %v335_v55 = vpack.c.bf16 %v318_v54, %v317_v53  ;;  %v1583_v56 = vld [vmem:[%s1740_s13 + $0x38] sm:$0xff]   ;;  %v1801_v61 = vrot.slane %v1798_v60, %v340_v59 }
  0x2e   : > { %1475 = vmatmul.mubr.msk.bf16.gmra.mrb[4].mxu0 %vm348_vm0, %v323_v16  ;;  %1553 = vmatprep.subr.bf16.mxu1 %v1579_v23 }
  0x2f   : > { %1478 = vmatprep.mubr.msk.bf16.mxu0 %vm348_vm0, %v324_v17  ;;  %1507 = vmatpush3.bf16.msra.mxu0 %v1578_v18 }
  0x30   : > { %1508 = vmatprep.subr.bf16.mxu0 %v1579_v23 }
  0x31   : > { %1561 = vmatpush3.bf16.msra.mxu1 %v1579_v23 }
  0x32   : > { %1554 = vmatprep.subr.bf16.mxu1 %v1580_v26 }
  0x33   : > { %1509 = vmatpush3.bf16.msra.mxu0 %v1579_v23 }
  0x34   : > { %1510 = vmatprep.subr.bf16.mxu0 %v1580_v26 }
  0x35   : > { %1562 = vmatpush3.bf16.msra.mxu1 %v1580_v26 }
  0x36   : > { %1479 = vmatmul.mubr.msk.bf16.gmra.mrb[8].mxu0 %vm348_vm0, %v325_v24  ;;  %1555 = vmatprep.subr.bf16.mxu1 %v1581_v31 }
  0x37   : > { %1482 = vmatprep.mubr.msk.bf16.mxu0 %vm348_vm0, %v326_v25  ;;  %1511 = vmatpush3.bf16.msra.mxu0 %v1580_v26 }
  0x38   : > { %1512 = vmatprep.subr.bf16.mxu0 %v1581_v31 }
  0x39   : > { %1563 = vmatpush3.bf16.msra.mxu1 %v1581_v31 }
  0x3a   : > { %1556 = vmatprep.subr.bf16.mxu1 %v1582_v34 }
  0x3b   : > { %1513 = vmatpush3.bf16.msra.mxu0 %v1581_v31 }
  0x3c   : > { %1514 = vmatprep.subr.bf16.mxu0 %v1582_v34 }
  0x3d   : > { %1564 = vmatpush3.bf16.msra.mxu1 %v1582_v34 }
  0x3e   : > { %1483 = vmatmul.mubr.msk.bf16.gmra.mrb[12].mxu0 %vm348_vm0, %v327_v32  ;;  %1557 = vmatprep.subr.bf16.mxu1 %v1583_v56 }
  0x3f   : > { %1486 = vmatprep.mubr.msk.bf16.mxu0 %vm348_vm0, %v328_v33  ;;  %1515 = vmatpush3.bf16.msra.mxu0 %v1582_v34 }
  0x40   : > { %1516 = vmatprep.subr.bf16.mxu0 %v1583_v56 }
  0x41   : > { %1565 = vmatpush3.bf16.msra.mxu1 %v1583_v56 }
  0x43   : > { %1517 = vmatpush3.bf16.msra.mxu0 %v1583_v56 }
  0x46   : > { %1487 = vmatmul.mubr.msk.bf16.gmra.mrb[16].mxu0 %vm348_vm0, %v329_v39 }
  0x47   : > { %1490 = vmatprep.mubr.msk.bf16.mxu0 %vm348_vm0, %v330_v40 }
  0x4e   : > { %1491 = vmatmul.mubr.msk.bf16.gmra.mrb[20].mxu0 %vm348_vm0, %v331_v45 }
  0x4f   : > { %1494 = vmatprep.mubr.msk.bf16.mxu0 %vm348_vm0, %v332_v46 }
  0x56   : > { %1495 = vmatmul.mubr.msk.bf16.gmra.mrb[24].mxu0 %vm348_vm0, %v333_v51 }
  0x57   : > { %1498 = vmatprep.mubr.msk.bf16.mxu0 %vm348_vm0, %v334_v52 }
  0x5e   : > { %1499 = vmatmul.mubr.msk.bf16.gmra.mrb[28].mxu0 %vm348_vm0, %v335_v55 }
  0xf9   : > { %v1472_v62 = vpop.f32.mrb[0].mxu0 }
  0xfa   : > { %v440_v63 = vadd.f32 %v1472_v62, %v1801_v61  ;;  %v431_v0 = vpop.f32.mrb[1].mxu0 }
  0xfb   : > { %v432_v1 = vadd.f32 %v431_v0, %v1801_v61  ;;  %v1473_v2 = vpop.f32.mrb[2].mxu0 }
  0xfc   : > { %v443_v3 = vadd.f32 %v1473_v2, %v1801_v61  ;;  %v434_v4 = vpop.f32.mrb[3].mxu0  ;;  %v560_v6 = vmax.f32 %v440_v63, 0.0 }
  0xfd   : > { %v435_v5 = vadd.f32 %v434_v4, %v1801_v61  ;;  %v558_v8 = vmax.f32 %v432_v1, 0.0 }
  0xfe   : > { %v561_v7 = vmax.f32 %v443_v3, 0.0 }
  0xff   : > { %v559_v9 = vmax.f32 %v435_v5, 0.0 }
 0x100   : > { %v591_v10 = vpack.c.bf16 %v561_v7, %v560_v6 }
 0x101   : > { %v590_v11 = vpack.c.bf16 %v559_v9, %v558_v8  ;;  %v1476_v12 = vpop.f32.mrb[4].mxu0 }
 0x102   : > { %v456_v13 = vadd.f32 %v1476_v12, %v1801_v61  ;;  %v447_v14 = vpop.f32.mrb[5].mxu0 }
 0x103   : > { %v448_v15 = vadd.f32 %v447_v14, %v1801_v61  ;;  %v1477_v16 = vpop.f32.mrb[6].mxu0  ;;  %1518 = vmatprep.mubr.bf16.mxu0 %v590_v11 }
 0x104   : > { %v564_v17 = vmax.f32 %v456_v13, 0.0  ;;  %v459_v18 = vadd.f32 %v1477_v16, %v1801_v61  ;;  %v450_v19 = vpop.f32.mrb[7].mxu0  ;;  %1519 = vmatmul.mubr.bf16.vlgmr.msra.gmra.mrb[32].mxu0 %v591_v10 }
 0x105   : > { %v451_v20 = vadd.f32 %v450_v19, %v1801_v61  ;;  %v562_v22 = vmax.f32 %v448_v15, 0.0 }
 0x106   : > { %v565_v21 = vmax.f32 %v459_v18, 0.0 }
 0x107   : > { %v563_v23 = vmax.f32 %v451_v20, 0.0 }
 0x108   : > { %v593_v24 = vpack.c.bf16 %v565_v21, %v564_v17 }
 0x109   : > { %v1480_v25 = vpop.f32.mrb[8].mxu0  ;;  %v592_v26 = vpack.c.bf16 %v563_v23, %v562_v22 }
 0x10a   : > { %v472_v27 = vadd.f32 %v1480_v25, %v1801_v61  ;;  %v463_v28 = vpop.f32.mrb[9].mxu0 }
 0x10b   : > { %v464_v29 = vadd.f32 %v463_v28, %v1801_v61  ;;  %v1481_v30 = vpop.f32.mrb[10].mxu0  ;;  %1522 = vmatprep.mubr.bf16.mxu1 %v592_v26 }
 0x10c   : > { %v568_v31 = vmax.f32 %v472_v27, 0.0  ;;  %v475_v32 = vadd.f32 %v1481_v30, %v1801_v61  ;;  %v466_v33 = vpop.f32.mrb[11].mxu0  ;;  %1523 = vmatmul.mubr.bf16.vlgmr.msra.gmra.mrb[0].mxu1 %v593_v24 }
 0x10d   : > { %v467_v34 = vadd.f32 %v466_v33, %v1801_v61  ;;  %v566_v36 = vmax.f32 %v464_v29, 0.0 }
 0x10e   : > { %v569_v35 = vmax.f32 %v475_v32, 0.0 }
 0x10f   : > { %v567_v37 = vmax.f32 %v467_v34, 0.0 }
 0x110   : > { %v595_v38 = vpack.c.bf16 %v569_v35, %v568_v31 }
 0x111   : > { %v594_v39 = vpack.c.bf16 %v567_v37, %v566_v36  ;;  %v1484_v40 = vpop.f32.mrb[12].mxu0 }
 0x112   : > { %v488_v41 = vadd.f32 %v1484_v40, %v1801_v61  ;;  %v479_v42 = vpop.f32.mrb[13].mxu0 }
 0x113   : > { %v480_v43 = vadd.f32 %v479_v42, %v1801_v61  ;;  %v1485_v44 = vpop.f32.mrb[14].mxu0  ;;  %1526 = vmatprep.mubr.bf16.mxu1 %v594_v39 }
 0x114   : > { %v572_v45 = vmax.f32 %v488_v41, 0.0  ;;  %v491_v46 = vadd.f32 %v1485_v44, %v1801_v61  ;;  %v482_v47 = vpop.f32.mrb[15].mxu0  ;;  %1527 = vmatmul.mubr.bf16.gmra.mrb[4].mxu1 %v595_v38 }
 0x115   : > { %v483_v48 = vadd.f32 %v482_v47, %v1801_v61  ;;  %v570_v50 = vmax.f32 %v480_v43, 0.0 }
 0x116   : > { %v573_v49 = vmax.f32 %v491_v46, 0.0 }
 0x117   : > { %v571_v51 = vmax.f32 %v483_v48, 0.0 }
 0x118   : > { %v597_v52 = vpack.c.bf16 %v573_v49, %v572_v45  ;;  %v624_v49 = vsub.s32 1, %v1792_v58 }
 0x119   : > { %v596_v53 = vpack.c.bf16 %v571_v51, %v570_v50  ;;  %v1488_v54 = vpop.f32.mrb[16].mxu0 }
 0x11a   : > { %v504_v55 = vadd.f32 %v1488_v54, %v1801_v61  ;;  %v495_v56 = vpop.f32.mrb[17].mxu0  ;;  %v1837_v50 = vrot.slane %v1798_v60, %v624_v49 }
 0x11b   : > { %v496_v57 = vadd.f32 %v495_v56, %v1801_v61  ;;  %v1489_v59 = vpop.f32.mrb[18].mxu0  ;;  %1530 = vmatprep.mubr.bf16.mxu1 %v596_v53 }
 0x11c   : > { %v576_v62 = vmax.f32 %v504_v55, 0.0  ;;  %v507_v63 = vadd.f32 %v1489_v59, %v1801_v61  ;;  %v498_v0 = vpop.f32.mrb[19].mxu0  ;;  %1531 = vmatmul.mubr.bf16.gmra.mrb[8].mxu1 %v597_v52 }
 0x11d   : > { %v499_v1 = vadd.f32 %v498_v0, %v1801_v61  ;;  %v574_v3 = vmax.f32 %v496_v57, 0.0 }
 0x11e   : > { %v577_v2 = vmax.f32 %v507_v63, 0.0 }
 0x11f   : > { %v575_v4 = vmax.f32 %v499_v1, 0.0 }
 0x120   : > { %v599_v5 = vpack.c.bf16 %v577_v2, %v576_v62 }
 0x121   : > { %v598_v6 = vpack.c.bf16 %v575_v4, %v574_v3  ;;  %v1492_v7 = vpop.f32.mrb[20].mxu0 }
 0x122   : > { %v520_v8 = vadd.f32 %v1492_v7, %v1801_v61  ;;  %v511_v9 = vpop.f32.mrb[21].mxu0 }
 0x123   : > { %v512_v10 = vadd.f32 %v511_v9, %v1801_v61  ;;  %v1493_v11 = vpop.f32.mrb[22].mxu0  ;;  %1534 = vmatprep.mubr.bf16.mxu1 %v598_v6 }
 0x124   : > { %v580_v12 = vmax.f32 %v520_v8, 0.0  ;;  %v523_v13 = vadd.f32 %v1493_v11, %v1801_v61  ;;  %v514_v14 = vpop.f32.mrb[23].mxu0  ;;  %1535 = vmatmul.mubr.bf16.gmra.mrb[12].mxu1 %v599_v5 }
 0x125   : > { %v515_v15 = vadd.f32 %v514_v14, %v1801_v61  ;;  %v578_v17 = vmax.f32 %v512_v10, 0.0 }
 0x126   : > { %v581_v16 = vmax.f32 %v523_v13, 0.0 }
 0x127   : > { %v579_v18 = vmax.f32 %v515_v15, 0.0 }
 0x128   : > { %v601_v19 = vpack.c.bf16 %v581_v16, %v580_v12 }
 0x129   : > { %v600_v20 = vpack.c.bf16 %v579_v18, %v578_v17  ;;  %v1496_v21 = vpop.f32.mrb[24].mxu0 }
 0x12a   : > { %v536_v22 = vadd.f32 %v1496_v21, %v1801_v61  ;;  %v527_v23 = vpop.f32.mrb[25].mxu0 }
 0x12b   : > { %v528_v24 = vadd.f32 %v527_v23, %v1801_v61  ;;  %v1497_v25 = vpop.f32.mrb[26].mxu0  ;;  %1538 = vmatprep.mubr.bf16.mxu1 %v600_v20 }
 0x12c   : > { %v584_v26 = vmax.f32 %v536_v22, 0.0  ;;  %v539_v27 = vadd.f32 %v1497_v25, %v1801_v61  ;;  %v530_v28 = vpop.f32.mrb[27].mxu0  ;;  %1539 = vmatmul.mubr.bf16.gmra.mrb[16].mxu1 %v601_v19 }
 0x12d   : > { %v531_v29 = vadd.f32 %v530_v28, %v1801_v61  ;;  %v582_v31 = vmax.f32 %v528_v24, 0.0 }
 0x12e   : > { %v585_v30 = vmax.f32 %v539_v27, 0.0 }
 0x12f   : > { %v583_v32 = vmax.f32 %v531_v29, 0.0 }
 0x130   : > { %v603_v33 = vpack.c.bf16 %v585_v30, %v584_v26 }
 0x131   : > { %v602_v34 = vpack.c.bf16 %v583_v32, %v582_v31  ;;  %v1500_v35 = vpop.f32.mrb[28].mxu0 }
 0x132   : > { %v552_v36 = vadd.f32 %v1500_v35, %v1801_v61  ;;  %v543_v37 = vpop.f32.mrb[29].mxu0 }
 0x133   : > { %v544_v38 = vadd.f32 %v543_v37, %v1801_v61  ;;  %v1501_v39 = vpop.f32.mrb[30].mxu0  ;;  %1542 = vmatprep.mubr.bf16.mxu1 %v602_v34 }
 0x134   : > { %v588_v40 = vmax.f32 %v552_v36, 0.0  ;;  %v555_v41 = vadd.f32 %v1501_v39, %v1801_v61  ;;  %v546_v42 = vpop.f32.mrb[31].mxu0  ;;  %1543 = vmatmul.mubr.bf16.gmra.mrb[20].mxu1 %v603_v33 }
 0x135   : > { %v547_v43 = vadd.f32 %v546_v42, %v1801_v61  ;;  %v586_v45 = vmax.f32 %v544_v38, 0.0 }
 0x136   : > { %v589_v44 = vmax.f32 %v555_v41, 0.0 }
 0x137   : > { %v587_v46 = vmax.f32 %v547_v43, 0.0 }
 0x138   : > { %v605_v47 = vpack.c.bf16 %v589_v44, %v588_v40 }
 0x139   : > { %v604_v48 = vpack.c.bf16 %v587_v46, %v586_v45 }
 0x13b   : > { %1546 = vmatprep.mubr.bf16.mxu1 %v604_v48 }
 0x13c   : > { %1547 = vmatmul.mubr.bf16.gmra.mrb[24].mxu1 %v605_v47 }
 0x1d7   : > { %v1520_v51 = vpop.f32.mrb[32].mxu0 }
 0x1d8   : > { %v1840_v52 = vadd.f32 %v1520_v51, %v1837_v50  ;;  %v708_v53 = vpop.f32.mrb[33].mxu0 }
 0x1d9   : > { %v1843_v54 = vadd.f32 %v708_v53, %v1837_v50  ;;  %v1521_v61 = vpop.f32.mrb[34].mxu0 }
 0x1da   : > { %839 = vadd.xlane.f32.xlu1 %v1840_v52  ;;  %v711_v55 = vpop.f32.mrb[35].mxu0  ;;  %v1848_v56 = vadd.f32 %v1521_v61, %v1837_v50 }
 0x1db   : > { %835 = vadd.xlane.f32.xlu0 %v1843_v54  ;;  %v1851_v57 = vadd.f32 %v711_v55, %v1837_v50 }
 0x1de   : > { %841 = vadd.xlane.f32.xlu1 %v1848_v56 }
 0x1df   : > { %v1524_v59 = vpop.f32.mrb[0].mxu1  ;;  %837 = vadd.xlane.f32.xlu0 %v1851_v57 }
 0x1e0   : > { %v1856_v62 = vadd.f32 %v1524_v59, %v1837_v50  ;;  %v724_v63 = vpop.f32.mrb[1].mxu1 }
 0x1e1   : > { %v1525_v0 = vpop.f32.mrb[2].mxu1  ;;  %v1864_v3 = vadd.f32 %v724_v63, %v1837_v50 }
 0x1e2   : > { %v1859_v1 = vadd.f32 %v1525_v0, %v1837_v50  ;;  %v727_v2 = vpop.f32.mrb[3].mxu1 }
 0x1e3   : > { %847 = vadd.xlane.f32.xlu0 %v1856_v62  ;;  %v1867_v4 = vadd.f32 %v727_v2, %v1837_v50 }
 0x1e4   : > { %849 = vadd.xlane.f32.xlu1 %v1859_v1 }
 0x1e7   : > { %v1528_v5 = vpop.f32.mrb[4].mxu1  ;;  %843 = vadd.xlane.f32.xlu0 %v1864_v3 }
 0x1e8   : > { %v1871_v6 = vadd.f32 %v1528_v5, %v1837_v50  ;;  %v740_v7 = vpop.f32.mrb[5].mxu1  ;;  %845 = vadd.xlane.f32.xlu1 %v1867_v4 }
 0x1e9   : > { %v1529_v8 = vpop.f32.mrb[6].mxu1  ;;  %v1880_v11 = vadd.f32 %v740_v7, %v1837_v50 }
 0x1ea   : > { %v1875_v9 = vadd.f32 %v1529_v8, %v1837_v50  ;;  %v743_v10 = vpop.f32.mrb[7].mxu1 }
 0x1eb   : > { %855 = vadd.xlane.f32.xlu0 %v1871_v6  ;;  %v1883_v12 = vadd.f32 %v743_v10, %v1837_v50 }
 0x1ec   : > { %857 = vadd.xlane.f32.xlu1 %v1875_v9 }
 0x1ef   : > { %v1532_v13 = vpop.f32.mrb[8].mxu1  ;;  %851 = vadd.xlane.f32.xlu0 %v1880_v11 }
 0x1f0   : > { %v1887_v14 = vadd.f32 %v1532_v13, %v1837_v50  ;;  %v756_v15 = vpop.f32.mrb[9].mxu1  ;;  %853 = vadd.xlane.f32.xlu1 %v1883_v12 }
 0x1f1   : > { %v1533_v16 = vpop.f32.mrb[10].mxu1  ;;  %v1896_v19 = vadd.f32 %v756_v15, %v1837_v50 }
 0x1f2   : > { %v1891_v17 = vadd.f32 %v1533_v16, %v1837_v50  ;;  %v759_v18 = vpop.f32.mrb[11].mxu1 }
 0x1f3   : > { %863 = vadd.xlane.f32.xlu0 %v1887_v14  ;;  %v1899_v20 = vadd.f32 %v759_v18, %v1837_v50 }
 0x1f4   : > { %865 = vadd.xlane.f32.xlu1 %v1891_v17 }
 0x1f7   : > { %v1536_v21 = vpop.f32.mrb[12].mxu1  ;;  %859 = vadd.xlane.f32.xlu0 %v1896_v19 }
 0x1f8   : > { %v1903_v22 = vadd.f32 %v1536_v21, %v1837_v50  ;;  %v772_v23 = vpop.f32.mrb[13].mxu1  ;;  %861 = vadd.xlane.f32.xlu1 %v1899_v20 }
 0x1f9   : > { %v1537_v24 = vpop.f32.mrb[14].mxu1  ;;  %v1912_v27 = vadd.f32 %v772_v23, %v1837_v50 }
 0x1fa   : > { %v1907_v25 = vadd.f32 %v1537_v24, %v1837_v50  ;;  %v775_v26 = vpop.f32.mrb[15].mxu1 }
 0x1fb   : > { %871 = vadd.xlane.f32.xlu0 %v1903_v22  ;;  %v1915_v28 = vadd.f32 %v775_v26, %v1837_v50 }
 0x1fc   : > { %873 = vadd.xlane.f32.xlu1 %v1907_v25 }
 0x1ff   : > { %v1540_v29 = vpop.f32.mrb[16].mxu1  ;;  %867 = vadd.xlane.f32.xlu0 %v1912_v27 }
 0x200   : > { %v1919_v30 = vadd.f32 %v1540_v29, %v1837_v50  ;;  %v788_v31 = vpop.f32.mrb[17].mxu1  ;;  %869 = vadd.xlane.f32.xlu1 %v1915_v28 }
 0x201   : > { %v1541_v32 = vpop.f32.mrb[18].mxu1  ;;  %v1928_v35 = vadd.f32 %v788_v31, %v1837_v50 }
 0x202   : > { %v1923_v33 = vadd.f32 %v1541_v32, %v1837_v50  ;;  %v791_v34 = vpop.f32.mrb[19].mxu1 }
 0x203   : > { %879 = vadd.xlane.f32.xlu0 %v1919_v30  ;;  %v1931_v36 = vadd.f32 %v791_v34, %v1837_v50 }
 0x204   : > { %881 = vadd.xlane.f32.xlu1 %v1923_v33 }
 0x207   : > { %v1544_v37 = vpop.f32.mrb[20].mxu1  ;;  %875 = vadd.xlane.f32.xlu0 %v1928_v35 }
 0x208   : > { %v1935_v38 = vadd.f32 %v1544_v37, %v1837_v50  ;;  %v804_v39 = vpop.f32.mrb[21].mxu1  ;;  %877 = vadd.xlane.f32.xlu1 %v1931_v36 }
 0x209   : > { %v1545_v40 = vpop.f32.mrb[22].mxu1  ;;  %v1944_v43 = vadd.f32 %v804_v39, %v1837_v50 }
 0x20a   : > { %v1939_v41 = vadd.f32 %v1545_v40, %v1837_v50  ;;  %v807_v42 = vpop.f32.mrb[23].mxu1 }
 0x20b   : > { %887 = vadd.xlane.f32.xlu0 %v1935_v38  ;;  %v1947_v44 = vadd.f32 %v807_v42, %v1837_v50 }
 0x20c   : > { %889 = vadd.xlane.f32.xlu1 %v1939_v41 }
 0x20f   : > { %v1548_v45 = vpop.f32.mrb[24].mxu1  ;;  %883 = vadd.xlane.f32.xlu0 %v1944_v43 }
 0x210   : > { %v820_v46 = vpop.f32.mrb[25].mxu1  ;;  %885 = vadd.xlane.f32.xlu1 %v1947_v44  ;;  %v1962_v61 = vadd.f32 %v1548_v45, %v1837_v50 }
 0x211   : > { %v1952_v47 = vadd.f32 %v820_v46, %v1837_v50  ;;  %v1549_v48 = vpop.f32.mrb[26].mxu1 }
 0x212   : > { %v1955_v49 = vadd.f32 %v1549_v48, %v1837_v50  ;;  %v823_v51 = vpop.f32.mrb[27].mxu1 }
 0x213   : > { %v1958_v53 = vadd.f32 %v823_v51, %v1837_v50  ;;  %891 = vadd.xlane.f32.xlu0 %v1952_v47 }
 0x215   : > { %893 = vadd.xlane.f32.xlu1 %v1958_v53 }
 0x217   : > { %895 = vadd.xlane.f32.xlu0 %v1962_v61 }
 0x219   : > { %897 = vadd.xlane.f32.xlu1 %v1955_v49 }
 0x267   : > { %v840_v55 = vpop.xlane.xlu1 %839 }
 0x268   : > { %v902_v59 = vmul.f32 0.0078125, %v840_v55  ;;  %v836_v63 = vpop.xlane.xlu0 %835 }
 0x269   : > { %v900_v0 = vmul.f32 0.0078125, %v836_v63 }
 0x26a   : > { %v1968_v2 = vsub.f32 %v1840_v52, %v902_v59 }
 0x26b   : > { %v842_v5 = vpop.xlane.xlu1 %841  ;;  %v1971_v7 = vsub.f32 %v1843_v54, %v900_v0 }
 0x26c   : > { %v903_v8 = vmul.f32 0.0078125, %v842_v5  ;;  %v838_v50 = vpop.xlane.xlu0 %837  ;;  %v966_v10 = vmul.f32 %v1968_v2, %v1968_v2 }
 0x26d   : > { %v901_v13 = vmul.f32 0.0078125, %v838_v50  ;;  %v964_v54 = vmul.f32 %v1971_v7, %v1971_v7 }
 0x26e   : > { %v1976_v15 = vsub.f32 %v1848_v56, %v903_v8  ;;  %1000 = vadd.xlane.f32.xlu0 %v966_v10 }
 0x26f   : > { %v1979_v16 = vsub.f32 %v1851_v57, %v901_v13 }
 0x270   : > { %v848_v18 = vpop.xlane.xlu0 %847  ;;  %v967_v52 = vmul.f32 %v1976_v15, %v1976_v15 }
 0x271   : > { %v906_v21 = vmul.f32 0.0078125, %v848_v18  ;;  %v850_v23 = vpop.xlane.xlu1 %849  ;;  %v965_v29 = vmul.f32 %v1979_v16, %v1979_v16 }
 0x272   : > { %v907_v24 = vmul.f32 0.0078125, %v850_v23  ;;  %1002 = vadd.xlane.f32.xlu1 %v967_v52  ;;  %996 = vadd.xlane.f32.xlu0 %v964_v54 }
 0x273   : > { %v1986_v26 = vsub.f32 %v1856_v62, %v906_v21 }
 0x274   : > { %v1989_v56 = vsub.f32 %v1859_v1, %v907_v24  ;;  %v844_v57 = vpop.xlane.xlu0 %843 }
 0x275   : > { %v904_v31 = vmul.f32 0.0078125, %v844_v57  ;;  %v846_v32 = vpop.xlane.xlu1 %845  ;;  %v970_v34 = vmul.f32 %v1986_v26, %v1986_v26 }
 0x276   : > { %v905_v37 = vmul.f32 0.0078125, %v846_v32  ;;  %998 = vadd.xlane.f32.xlu1 %v965_v29  ;;  %v971_v40 = vmul.f32 %v1989_v56, %v1989_v56 }
 0x277   : > { %v1996_v39 = vsub.f32 %v1864_v3, %v904_v31  ;;  %1008 = vadd.xlane.f32.xlu0 %v970_v34 }
 0x278   : > { %v1999_v62 = vsub.f32 %v1867_v4, %v905_v37  ;;  %v856_v1 = vpop.xlane.xlu0 %855 }
 0x279   : > { %v910_v42 = vmul.f32 0.0078125, %v856_v1  ;;  %v858_v45 = vpop.xlane.xlu1 %857  ;;  %v968_v46 = vmul.f32 %v1996_v39, %v1996_v39 }
 0x27a   : > { %v911_v48 = vmul.f32 0.0078125, %v858_v45  ;;  %1010 = vadd.xlane.f32.xlu1 %v971_v40  ;;  %v969_v55 = vmul.f32 %v1999_v62, %v1999_v62 }
 0x27b   : > { %v2006_v51 = vsub.f32 %v1871_v6, %v910_v42  ;;  %1004 = vadd.xlane.f32.xlu0 %v968_v46 }
 0x27c   : > { %v2009_v3 = vsub.f32 %v1875_v9, %v911_v48  ;;  %v852_v4 = vpop.xlane.xlu0 %851 }
 0x27d   : > { %v908_v59 = vmul.f32 0.0078125, %v852_v4  ;;  %v854_v63 = vpop.xlane.xlu1 %853  ;;  %v974_v0 = vmul.f32 %v2006_v51, %v2006_v51 }
 0x27e   : > { %v909_v5 = vmul.f32 0.0078125, %v854_v63  ;;  %1006 = vadd.xlane.f32.xlu1 %v969_v55  ;;  %v975_v50 = vmul.f32 %v2009_v3, %v2009_v3 }
 0x27f   : > { %v2016_v8 = vsub.f32 %v1880_v11, %v908_v59  ;;  %1016 = vadd.xlane.f32.xlu0 %v974_v0 }
 0x280   : > { %v2019_v6 = vsub.f32 %v1883_v12, %v909_v5  ;;  %v864_v9 = vpop.xlane.xlu0 %863 }
 0x281   : > { %v914_v10 = vmul.f32 0.0078125, %v864_v9  ;;  %v866_v13 = vpop.xlane.xlu1 %865  ;;  %v972_v18 = vmul.f32 %v2016_v8, %v2016_v8 }
 0x282   : > { %v915_v52 = vmul.f32 0.0078125, %v866_v13  ;;  %1018 = vadd.xlane.f32.xlu1 %v975_v50  ;;  %v973_v21 = vmul.f32 %v2019_v6, %v2019_v6 }
 0x283   : > { %v2026_v54 = vsub.f32 %v1887_v14, %v914_v10  ;;  %1012 = vadd.xlane.f32.xlu0 %v972_v18 }
 0x284   : > { %v2029_v11 = vsub.f32 %v1891_v17, %v915_v52  ;;  %v860_v12 = vpop.xlane.xlu0 %859 }
 0x285   : > { %v912_v23 = vmul.f32 0.0078125, %v860_v12  ;;  %v862_v24 = vpop.xlane.xlu1 %861  ;;  %v978_v57 = vmul.f32 %v2026_v54, %v2026_v54 }
 0x286   : > { %v913_v29 = vmul.f32 0.0078125, %v862_v24  ;;  %1014 = vadd.xlane.f32.xlu1 %v973_v21  ;;  %v979_v32 = vmul.f32 %v2029_v11, %v2029_v11 }
 0x287   : > { %v2036_v31 = vsub.f32 %v1896_v19, %v912_v23  ;;  %1024 = vadd.xlane.f32.xlu0 %v978_v57 }
 0x288   : > { %v2039_v14 = vsub.f32 %v1899_v20, %v913_v29  ;;  %v872_v17 = vpop.xlane.xlu0 %871 }
 0x289   : > { %v918_v34 = vmul.f32 0.0078125, %v872_v17  ;;  %v874_v37 = vpop.xlane.xlu1 %873  ;;  %v976_v1 = vmul.f32 %v2036_v31, %v2036_v31 }
 0x28a   : > { %v919_v40 = vmul.f32 0.0078125, %v874_v37  ;;  %1026 = vadd.xlane.f32.xlu1 %v979_v32  ;;  %v977_v45 = vmul.f32 %v2039_v14, %v2039_v14 }
 0x28b   : > { %v2046_v42 = vsub.f32 %v1903_v22, %v918_v34  ;;  %1020 = vadd.xlane.f32.xlu0 %v976_v1 }
 0x28c   : > { %v2049_v19 = vsub.f32 %v1907_v25, %v919_v40  ;;  %v868_v20 = vpop.xlane.xlu0 %867 }
 0x28d   : > { %v916_v46 = vmul.f32 0.0078125, %v868_v20  ;;  %v870_v48 = vpop.xlane.xlu1 %869  ;;  %v982_v4 = vmul.f32 %v2046_v42, %v2046_v42 }
 0x28e   : > { %v917_v55 = vmul.f32 0.0078125, %v870_v48  ;;  %1022 = vadd.xlane.f32.xlu1 %v977_v45  ;;  %v983_v63 = vmul.f32 %v2049_v19, %v2049_v19 }
 0x28f   : > { %v2056_v59 = vsub.f32 %v1912_v27, %v916_v46  ;;  %1032 = vadd.xlane.f32.xlu0 %v982_v4 }
 0x290   : > { %v2059_v22 = vsub.f32 %v1915_v28, %v917_v55  ;;  %v880_v25 = vpop.xlane.xlu0 %879 }
 0x291   : > { %v922_v0 = vmul.f32 0.0078125, %v880_v25  ;;  %v882_v5 = vpop.xlane.xlu1 %881  ;;  %v980_v9 = vmul.f32 %v2056_v59, %v2056_v59 }
 0x292   : > { %v923_v50 = vmul.f32 0.0078125, %v882_v5  ;;  %1034 = vadd.xlane.f32.xlu1 %v983_v63  ;;  %v981_v13 = vmul.f32 %v2059_v22, %v2059_v22 }
 0x293   : > { %v2066_v10 = vsub.f32 %v1919_v30, %v922_v0  ;;  %1028 = vadd.xlane.f32.xlu0 %v980_v9 }
 0x294   : > { %v2069_v27 = vsub.f32 %v1923_v33, %v923_v50  ;;  %v876_v28 = vpop.xlane.xlu0 %875 }
 0x295   : > { %v920_v18 = vmul.f32 0.0078125, %v876_v28  ;;  %v878_v52 = vpop.xlane.xlu1 %877  ;;  %v986_v12 = vmul.f32 %v2066_v10, %v2066_v10 }
 0x296   : > { %v921_v21 = vmul.f32 0.0078125, %v878_v52  ;;  %1030 = vadd.xlane.f32.xlu1 %v981_v13  ;;  %v987_v24 = vmul.f32 %v2069_v27, %v2069_v27 }
 0x297   : > { %v2076_v23 = vsub.f32 %v1928_v35, %v920_v18  ;;  %1040 = vadd.xlane.f32.xlu0 %v986_v12 }
 0x298   : > { %v2079_v30 = vsub.f32 %v1931_v36, %v921_v21  ;;  %v888_v33 = vpop.xlane.xlu0 %887 }
 0x299   : > { %v926_v57 = vmul.f32 0.0078125, %v888_v33  ;;  %v890_v29 = vpop.xlane.xlu1 %889  ;;  %v984_v17 = vmul.f32 %v2076_v23, %v2076_v23 }
 0x29a   : > { %v927_v32 = vmul.f32 0.0078125, %v890_v29  ;;  %1042 = vadd.xlane.f32.xlu1 %v987_v24  ;;  %v985_v37 = vmul.f32 %v2079_v30, %v2079_v30 }
 0x29b   : > { %v2086_v34 = vsub.f32 %v1935_v38, %v926_v57  ;;  %1036 = vadd.xlane.f32.xlu0 %v984_v17 }
 0x29c   : > { %v2089_v35 = vsub.f32 %v1939_v41, %v927_v32  ;;  %v884_v36 = vpop.xlane.xlu0 %883 }
 0x29d   : > { %v924_v1 = vmul.f32 0.0078125, %v884_v36  ;;  %v886_v40 = vpop.xlane.xlu1 %885  ;;  %v990_v20 = vmul.f32 %v2086_v34, %v2086_v34 }
 0x29e   : > { %v925_v45 = vmul.f32 0.0078125, %v886_v40  ;;  %1038 = vadd.xlane.f32.xlu1 %v985_v37  ;;  %v991_v48 = vmul.f32 %v2089_v35, %v2089_v35  ;;  %v1190_v40 = vsub.s32 2, %v1792_v58 }
 0x29f   : > { %v2096_v46 = vsub.f32 %v1944_v43, %v924_v1  ;;  %1048 = vadd.xlane.f32.xlu0 %v990_v20 }
 0x2a0   : > { %v2099_v38 = vsub.f32 %v1947_v44, %v925_v45  ;;  %v892_v41 = vpop.xlane.xlu0 %891 }
 0x2a1   : > { %v928_v4 = vmul.f32 0.0078125, %v892_v41  ;;  %v988_v55 = vmul.f32 %v2096_v46, %v2096_v46  ;;  %v1226_v41 = vsub.s32 3, %v1792_v58 }
 0x2a2   : > { %v894_v25 = vpop.xlane.xlu1 %893  ;;  %1050 = vadd.xlane.f32.xlu1 %v991_v48  ;;  %v989_v44 = vmul.f32 %v2099_v38, %v2099_v38 }
 0x2a3   : > { %v2106_v63 = vsub.f32 %v1952_v47, %v928_v4  ;;  %v929_v0 = vmul.f32 0.0078125, %v894_v25  ;;  %1044 = vadd.xlane.f32.xlu0 %v988_v55 }
 0x2a4   : > { %v896_v43 = vpop.xlane.xlu0 %895 }
 0x2a5   : > { %v2111_v5 = vsub.f32 %v1958_v53, %v929_v0  ;;  %v930_v9 = vmul.f32 0.0078125, %v896_v43  ;;  %v992_v50 = vmul.f32 %v2106_v63, %v2106_v63  ;;  %v2130_v0 = vrot.slane %v1798_v60, %v1190_v40 }
 0x2a6   : > { %v898_v28 = vpop.xlane.xlu1 %897  ;;  %1046 = vadd.xlane.f32.xlu1 %v989_v44 }
 0x2a7   : > { %v2116_v13 = vsub.f32 %v1962_v61, %v930_v9  ;;  %v931_v47 = vmul.f32 0.0078125, %v898_v28  ;;  %1052 = vadd.xlane.f32.xlu0 %v992_v50  ;;  %v993_v18 = vmul.f32 %v2111_v5, %v2111_v5  ;;  %v2133_v50 = vrot.slane %v1798_v60, %v1226_v41 }
 0x2a9   : > { %v2121_v52 = vsub.f32 %v1955_v49, %v931_v47  ;;  %v994_v53 = vmul.f32 %v2116_v13, %v2116_v13 }
 0x2aa   : > { %1054 = vadd.xlane.f32.xlu1 %v993_v18 }
 0x2ab   : > { %1056 = vadd.xlane.f32.xlu0 %v994_v53  ;;  %v995_v12 = vmul.f32 %v2121_v52, %v2121_v52 }
 0x2ae   : > { %1058 = vadd.xlane.f32.xlu1 %v995_v12 }
 0x2fb   : > { %v1001_v21 = vpop.xlane.xlu0 %1000 }
 0x2fc   : > { %v1062_v61 = vmul.f32 0.0078125, %v1001_v21 }
 0x2fe   : > { %v1094_v33 = vadd.f32 1e-05, %v1062_v61 }
 0x2ff   : > { %v1003_v24 = vpop.xlane.xlu1 %1002  ;;  %v997_v57 = vpop.xlane.xlu0 %996 }
 0x300   : > { %1584 = vrsqrt.f32 %v1094_v33  ;;  %v1063_v29 = vmul.f32 0.0078125, %v1003_v24  ;;  %v1060_v17 = vmul.f32 0.0078125, %v997_v57 }
 0x302   : > { %v1095_v32 = vadd.f32 1e-05, %v1063_v29  ;;  %v1092_v49 = vadd.f32 1e-05, %v1060_v17 }
 0x303   : > { %v999_v36 = vpop.xlane.xlu1 %998 }
 0x304   : > { %1586 = vrsqrt.f32 %v1095_v32  ;;  %v1061_v37 = vmul.f32 0.0078125, %v999_v36  ;;  %v1009_v1 = vpop.xlane.xlu0 %1008 }
 0x305   : > { %1588 = vrsqrt.f32 %v1092_v49  ;;  %v1066_v20 = vmul.f32 0.0078125, %v1009_v1 }
 0x306   : > { %v1093_v45 = vadd.f32 1e-05, %v1061_v37 }
 0x307   : > { %v1098_v48 = vadd.f32 1e-05, %v1066_v20  ;;  %v1011_v4 = vpop.xlane.xlu1 %1010 }
 0x308   : > { %1590 = vrsqrt.f32 %v1093_v45  ;;  %v1067_v55 = vmul.f32 0.0078125, %v1011_v4  ;;  %v1005_v25 = vpop.xlane.xlu0 %1004 }
 0x309   : > { %1592 = vrsqrt.f32 %v1098_v48  ;;  %v1064_v43 = vmul.f32 0.0078125, %v1005_v25 }
 0x30a   : > { %v1585_v44 = vpop.eup %1584  ;;  %v1099_v9 = vadd.f32 1e-05, %v1067_v55 }
 0x30b   : > { %v1158_v28 = vmul.f32 %v1585_v44, %v1968_v2  ;;  %v1096_v47 = vadd.f32 1e-05, %v1064_v43  ;;  %v1007_v58 = vpop.xlane.xlu1 %1006 }
 0x30c   : > { %1594 = vrsqrt.f32 %v1099_v9  ;;  %v1065_v18 = vmul.f32 0.0078125, %v1007_v58  ;;  %v1017_v53 = vpop.xlane.xlu0 %1016 }
 0x30d   : > { %v1194_v12 = vmul.f32 %v2130_v0, %v1158_v28  ;;  %1596 = vrsqrt.f32 %v1096_v47  ;;  %v1070_v21 = vmul.f32 0.0078125, %v1017_v53 }
 0x30e   : > { %v1587_v61 = vpop.eup %1586  ;;  %v1097_v60 = vadd.f32 1e-05, %v1065_v18 }
 0x30f   : > { %v1589_v33 = vpop.eup %1588  ;;  %v1230_v2 = vadd.f32 %v2133_v50, %v1194_v12  ;;  %v1159_v24 = vmul.f32 %v1587_v61, %v1976_v15  ;;  %v1102_v57 = vadd.f32 1e-05, %v1070_v21  ;;  %v1019_v29 = vpop.xlane.xlu1 %1018 }
 0x310   : > { %v1156_v17 = vmul.f32 %v1589_v33, %v1971_v7  ;;  %1598 = vrsqrt.f32 %v1097_v60  ;;  %v1071_v32 = vmul.f32 0.0078125, %v1019_v29  ;;  %v1013_v49 = vpop.xlane.xlu0 %1012 }
 0x311   : > { %1262 = vst [vmem:[%s2142_s21 + $0x10] sm:$0xff] %v1230_v2  ;;  %v1195_v36 = vmul.f32 %v2130_v0, %v1159_v24  ;;  %1600 = vrsqrt.f32 %v1102_v57  ;;  %v1068_v37 = vmul.f32 0.0078125, %v1013_v49 }
 0x312   : > { %v1591_v1 = vpop.eup %1590  ;;  %v1192_v40 = vmul.f32 %v2130_v0, %v1156_v17  ;;  %v1103_v20 = vadd.f32 1e-05, %v1071_v32 }
 0x313   : > { %v1593_v45 = vpop.eup %1592  ;;  %v1231_v15 = vadd.f32 %v2133_v50, %v1195_v36  ;;  %v1157_v41 = vmul.f32 %v1591_v1, %v1979_v16  ;;  %v1100_v7 = vadd.f32 1e-05, %v1068_v37  ;;  %v1015_v48 = vpop.xlane.xlu1 %1014 }
 0x314   : > { %v1228_v4 = vadd.f32 %v2133_v50, %v1192_v40  ;;  %v1162_v55 = vmul.f32 %v1593_v45, %v1986_v26  ;;  %1602 = vrsqrt.f32 %v1103_v20  ;;  %v1069_v25 = vmul.f32 0.0078125, %v1015_v48  ;;  %v1025_v43 = vpop.xlane.xlu0 %1024 }
 0x315   : > { %1263 = vst [vmem:[%s2142_s21 + $0x18] sm:$0xff] %v1231_v15  ;;  %v1193_v44 = vmul.f32 %v2130_v0, %v1157_v41  ;;  %1604 = vrsqrt.f32 %v1100_v7  ;;  %v1074_v9 = vmul.f32 0.0078125, %v1025_v43 }
 0x316   : > { %v1595_v28 = vpop.eup %1594  ;;  %1260 = vst [vmem:[%s2142_s21] sm:$0xff] %v1228_v4  ;;  %v1198_v47 = vmul.f32 %v2130_v0, %v1162_v55  ;;  %v1101_v16 = vadd.f32 1e-05, %v1069_v25 }
 0x317   : > { %v1597_v58 = vpop.eup %1596  ;;  %v1229_v18 = vadd.f32 %v2133_v50, %v1193_v44  ;;  %v1163_v26 = vmul.f32 %v1595_v28, %v1989_v56  ;;  %v1106_v53 = vadd.f32 1e-05, %v1074_v9  ;;  %v1027_v12 = vpop.xlane.xlu1 %1026 }
 0x318   : > { %v1234_v21 = vadd.f32 %v2133_v50, %v1198_v47  ;;  %v1160_v61 = vmul.f32 %v1597_v58, %v1996_v39  ;;  %1606 = vrsqrt.f32 %v1101_v16  ;;  %v1075_v60 = vmul.f32 0.0078125, %v1027_v12  ;;  %v1021_v33 = vpop.xlane.xlu0 %1020 }
 0x319   : > { %1261 = vst [vmem:[%s2142_s21 + $0x8] sm:$0xff] %v1229_v18  ;;  %v1199_v2 = vmul.f32 %v2130_v0, %v1163_v26  ;;  %1608 = vrsqrt.f32 %v1106_v53  ;;  %v1072_v24 = vmul.f32 0.0078125, %v1021_v33 }
 0x31a   : > { %v1599_v57 = vpop.eup %1598  ;;  %1266 = vst [vmem:[%s2142_s21 + $0x30] sm:$0xff] %v1234_v21  ;;  %v1196_v29 = vmul.f32 %v2130_v0, %v1160_v61  ;;  %v1107_v56 = vadd.f32 1e-05, %v1075_v60 }
 0x31b   : > { %v1601_v17 = vpop.eup %1600  ;;  %v1235_v32 = vadd.f32 %v2133_v50, %v1199_v2  ;;  %v1161_v39 = vmul.f32 %v1599_v57, %v1999_v62  ;;  %v1104_v49 = vadd.f32 1e-05, %v1072_v24  ;;  %v1023_v36 = vpop.xlane.xlu1 %1022 }
 0x31c   : > { %v1232_v37 = vadd.f32 %v2133_v50, %v1196_v29  ;;  %v1166_v1 = vmul.f32 %v1601_v17, %v2006_v51  ;;  %1610 = vrsqrt.f32 %v1107_v56  ;;  %v1073_v40 = vmul.f32 0.0078125, %v1023_v36  ;;  %v1033_v20 = vpop.xlane.xlu0 %1032 }
 0x31d   : > { %1267 = vst [vmem:[%s2142_s21 + $0x38] sm:$0xff] %v1235_v32  ;;  %v1197_v45 = vmul.f32 %v2130_v0, %v1161_v39  ;;  %1612 = vrsqrt.f32 %v1104_v49  ;;  %v1078_v15 = vmul.f32 0.0078125, %v1033_v20 }
 0x31e   : > { %v1603_v41 = vpop.eup %1602  ;;  %1264 = vst [vmem:[%s2142_s21 + $0x20] sm:$0xff] %v1232_v37  ;;  %v1202_v7 = vmul.f32 %v2130_v0, %v1166_v1  ;;  %v1105_v62 = vadd.f32 1e-05, %v1073_v40 }
 0x31f   : > { %v1605_v48 = vpop.eup %1604  ;;  %v1233_v4 = vadd.f32 %v2133_v50, %v1197_v45  ;;  %v1167_v51 = vmul.f32 %v1603_v41, %v2009_v3  ;;  %v1110_v55 = vadd.f32 1e-05, %v1078_v15  ;;  %v1035_v25 = vpop.xlane.xlu1 %1034 }
 0x320   : > { %v1238_v43 = vadd.f32 %v2133_v50, %v1202_v7  ;;  %v1164_v44 = vmul.f32 %v1605_v48, %v2016_v8  ;;  %1614 = vrsqrt.f32 %v1105_v62  ;;  %v1079_v9 = vmul.f32 0.0078125, %v1035_v25  ;;  %v1029_v28 = vpop.xlane.xlu0 %1028 }
 0x321   : > { %1265 = vst [vmem:[%s2142_s21 + $0x28] sm:$0xff] %v1233_v4  ;;  %v1203_v47 = vmul.f32 %v2130_v0, %v1167_v51  ;;  %1616 = vrsqrt.f32 %v1110_v55  ;;  %v1076_v16 = vmul.f32 0.0078125, %v1029_v28 }
 0x322   : > { %v1607_v58 = vpop.eup %1606  ;;  %1270 = vst [vmem:[%s2142_s21 + $0x50] sm:$0xff] %v1238_v43  ;;  %v1200_v18 = vmul.f32 %v2130_v0, %v1164_v44  ;;  %v1111_v3 = vadd.f32 1e-05, %v1079_v9 }
 0x323   : > { %v1609_v26 = vpop.eup %1608  ;;  %v1239_v53 = vadd.f32 %v2133_v50, %v1203_v47  ;;  %v1165_v8 = vmul.f32 %v1607_v58, %v2019_v6  ;;  %v1108_v12 = vadd.f32 1e-05, %v1076_v16  ;;  %v1031_v21 = vpop.xlane.xlu1 %1030 }
 0x324   : > { %v1236_v61 = vadd.f32 %v2133_v50, %v1200_v18  ;;  %v1170_v60 = vmul.f32 %v1609_v26, %v2026_v54  ;;  %1618 = vrsqrt.f32 %v1111_v3  ;;  %v1077_v33 = vmul.f32 0.0078125, %v1031_v21  ;;  %v1041_v2 = vpop.xlane.xlu0 %1040 }
 0x325   : > { %1271 = vst [vmem:[%s2142_s21 + $0x58] sm:$0xff] %v1239_v53  ;;  %v1201_v24 = vmul.f32 %v2130_v0, %v1165_v8  ;;  %1620 = vrsqrt.f32 %v1108_v12  ;;  %v1082_v57 = vmul.f32 0.0078125, %v1041_v2 }
 0x326   : > { %v1611_v29 = vpop.eup %1610  ;;  %1268 = vst [vmem:[%s2142_s21 + $0x40] sm:$0xff] %v1236_v61  ;;  %v1206_v56 = vmul.f32 %v2130_v0, %v1170_v60  ;;  %v1109_v6 = vadd.f32 1e-05, %v1077_v33 }
 0x327   : > { %v1613_v17 = vpop.eup %1612  ;;  %v1237_v32 = vadd.f32 %v2133_v50, %v1201_v24  ;;  %v1171_v54 = vmul.f32 %v1611_v29, %v2029_v11  ;;  %v1114_v39 = vadd.f32 1e-05, %v1082_v57  ;;  %v1043_v49 = vpop.xlane.xlu1 %1042 }
 0x328   : > { %v1242_v36 = vadd.f32 %v2133_v50, %v1206_v56  ;;  %v1168_v37 = vmul.f32 %v1613_v17, %v2036_v31  ;;  %1622 = vrsqrt.f32 %v1109_v6  ;;  %v1083_v1 = vmul.f32 0.0078125, %v1043_v49  ;;  %v1037_v40 = vpop.xlane.xlu0 %1036 }
 0x329   : > { %1269 = vst [vmem:[%s2142_s21 + $0x48] sm:$0xff] %v1237_v32  ;;  %v1207_v20 = vmul.f32 %v2130_v0, %v1171_v54  ;;  %1624 = vrsqrt.f32 %v1114_v39  ;;  %v1080_v45 = vmul.f32 0.0078125, %v1037_v40 }
 0x32a   : > { %v1615_v15 = vpop.eup %1614  ;;  %1274 = vst [vmem:[%s2142_s21 + $0x70] sm:$0xff] %v1242_v36  ;;  %v1204_v41 = vmul.f32 %v2130_v0, %v1168_v37  ;;  %v1115_v11 = vadd.f32 1e-05, %v1083_v1 }
 0x32b   : > { %v1617_v7 = vpop.eup %1616  ;;  %v1243_v62 = vadd.f32 %v2133_v50, %v1207_v20  ;;  %v1169_v31 = vmul.f32 %v1615_v15, %v2039_v14  ;;  %v1112_v48 = vadd.f32 1e-05, %v1080_v45  ;;  %v1039_v4 = vpop.xlane.xlu1 %1038 }
 0x32c   : > { %v1240_v51 = vadd.f32 %v2133_v50, %v1204_v41  ;;  %v1174_v55 = vmul.f32 %v1617_v7, %v2046_v42  ;;  %1626 = vrsqrt.f32 %v1115_v11  ;;  %v1081_v25 = vmul.f32 0.0078125, %v1039_v4  ;;  %v1049_v43 = vpop.xlane.xlu0 %1048 }
 0x32d   : > { %1275 = vst [vmem:[%s2142_s21 + $0x78] sm:$0xff] %v1243_v62  ;;  %v1205_v44 = vmul.f32 %v2130_v0, %v1169_v31  ;;  %1628 = vrsqrt.f32 %v1112_v48  ;;  %v1086_v9 = vmul.f32 0.0078125, %v1049_v43 }
 0x32e   : > { %v1619_v28 = vpop.eup %1618  ;;  %1272 = vst [vmem:[%s2142_s21 + $0x60] sm:$0xff] %v1240_v51  ;;  %v1210_v47 = vmul.f32 %v2130_v0, %v1174_v55  ;;  %v1113_v14 = vadd.f32 1e-05, %v1081_v25 }
 0x32f   : > { %v1621_v16 = vpop.eup %1620  ;;  %v1241_v58 = vadd.f32 %v2133_v50, %v1205_v44  ;;  %v1175_v42 = vmul.f32 %v1619_v28, %v2049_v19  ;;  %v1118_v18 = vadd.f32 1e-05, %v1086_v9  ;;  %v1051_v3 = vpop.xlane.xlu1 %1050 }
 0x330   : > { %v1246_v26 = vadd.f32 %v2133_v50, %v1210_v47  ;;  %v1172_v53 = vmul.f32 %v1621_v16, %v2056_v59  ;;  %1630 = vrsqrt.f32 %v1113_v14  ;;  %v1087_v8 = vmul.f32 0.0078125, %v1051_v3  ;;  %v1045_v12 = vpop.xlane.xlu0 %1044 }
 0x331   : > { %1273 = vst [vmem:[%s2142_s21 + $0x68] sm:$0xff] %v1241_v58  ;;  %v1211_v21 = vmul.f32 %v2130_v0, %v1175_v42  ;;  %1632 = vrsqrt.f32 %v1118_v18  ;;  %v1084_v61 = vmul.f32 0.0078125, %v1045_v12 }
 0x332   : > { %v1623_v60 = vpop.eup %1622  ;;  %1278 = vst [vmem:[%s2142_s21 + $0x90] sm:$0xff] %v1246_v26  ;;  %v1208_v33 = vmul.f32 %v2130_v0, %v1172_v53  ;;  %v1119_v19 = vadd.f32 1e-05, %v1087_v8 }
 0x333   : > { %v1625_v2 = vpop.eup %1624  ;;  %v1247_v24 = vadd.f32 %v2133_v50, %v1211_v21  ;;  %v1173_v59 = vmul.f32 %v1623_v60, %v2059_v22  ;;  %v1116_v57 = vadd.f32 1e-05, %v1084_v61  ;;  %v1047_v29 = vpop.xlane.xlu1 %1046 }
 0x334   : > { %v1244_v56 = vadd.f32 %v2133_v50, %v1208_v33  ;;  %v1178_v6 = vmul.f32 %v1625_v2, %v2066_v10  ;;  %1634 = vrsqrt.f32 %v1119_v19  ;;  %v1085_v17 = vmul.f32 0.0078125, %v1047_v29  ;;  %v1053_v32 = vpop.xlane.xlu0 %1052 }
 0x335   : > { %1279 = vst [vmem:[%s2142_s21 + $0x98] sm:$0xff] %v1247_v24  ;;  %v1209_v54 = vmul.f32 %v2130_v0, %v1173_v59  ;;  %1636 = vrsqrt.f32 %v1116_v57  ;;  %v1088_v39 = vmul.f32 0.0078125, %v1053_v32 }
 0x336   : > { %v1627_v49 = vpop.eup %1626  ;;  %1276 = vst [vmem:[%s2142_s21 + $0x80] sm:$0xff] %v1244_v56  ;;  %v1214_v36 = vmul.f32 %v2130_v0, %v1178_v6  ;;  %v1117_v22 = vadd.f32 1e-05, %v1085_v17 }
 0x337   : > { %v1629_v37 = vpop.eup %1628  ;;  %v1245_v1 = vadd.f32 %v2133_v50, %v1209_v54  ;;  %v1179_v10 = vmul.f32 %v1627_v49, %v2069_v27  ;;  %v1120_v40 = vadd.f32 1e-05, %v1088_v39  ;;  %v1055_v20 = vpop.xlane.xlu1 %1054 }
 0x338   : > { %v1250_v45 = vadd.f32 %v2133_v50, %v1214_v36  ;;  %v1176_v15 = vmul.f32 %v1629_v37, %v2076_v23  ;;  %1638 = vrsqrt.f32 %v1117_v22  ;;  %v1089_v41 = vmul.f32 0.0078125, %v1055_v20  ;;  %v1057_v11 = vpop.xlane.xlu0 %1056 }
 0x339   : > { %1277 = vst [vmem:[%s2142_s21 + $0x88] sm:$0xff] %v1245_v1  ;;  %v1215_v7 = vmul.f32 %v2130_v0, %v1179_v10  ;;  %1640 = vrsqrt.f32 %v1120_v40  ;;  %v1090_v62 = vmul.f32 0.0078125, %v1057_v11 }
 0x33a   : > { %v1631_v31 = vpop.eup %1630  ;;  %1282 = vst [vmem:[%s2142_s21 + $0xb0] sm:$0xff] %v1250_v45  ;;  %v1212_v27 = vmul.f32 %v2130_v0, %v1176_v15  ;;  %v1121_v48 = vadd.f32 1e-05, %v1089_v41 }
 0x33b   : > { %v1633_v4 = vpop.eup %1632  ;;  %v1251_v51 = vadd.f32 %v2133_v50, %v1215_v7  ;;  %v1177_v23 = vmul.f32 %v1631_v31, %v2079_v30  ;;  %v1122_v55 = vadd.f32 1e-05, %v1090_v62  ;;  %v1059_v25 = vpop.xlane.xlu1 %1058 }
 0x33c   : > { %v1248_v43 = vadd.f32 %v2133_v50, %v1212_v27  ;;  %v1182_v44 = vmul.f32 %v1633_v4, %v2086_v34  ;;  %1642 = vrsqrt.f32 %v1121_v48  ;;  %v1091_v9 = vmul.f32 0.0078125, %v1059_v25 }
 0x33d   : > { %1283 = vst [vmem:[%s2142_s21 + $0xb8] sm:$0xff] %v1251_v51  ;;  %v1213_v28 = vmul.f32 %v2130_v0, %v1177_v23  ;;  %1644 = vrsqrt.f32 %v1122_v55 }
 0x33e   : > { %v1635_v47 = vpop.eup %1634  ;;  %1280 = vst [vmem:[%s2142_s21 + $0xa0] sm:$0xff] %v1248_v43  ;;  %v1218_v14 = vmul.f32 %v2130_v0, %v1182_v44  ;;  %v1123_v16 = vadd.f32 1e-05, %v1091_v9 }
 0x33f   : > { %v1637_v30 = vpop.eup %1636  ;;  %v1249_v58 = vadd.f32 %v2133_v50, %v1213_v28  ;;  %v1183_v42 = vmul.f32 %v1635_v47, %v2089_v35 }
 0x340   : > { %v1254_v34 = vadd.f32 %v2133_v50, %v1218_v14  ;;  %v1180_v18 = vmul.f32 %v1637_v30, %v2096_v46  ;;  %1646 = vrsqrt.f32 %v1123_v16 }
 0x341   : > { %1281 = vst [vmem:[%s2142_s21 + $0xa8] sm:$0xff] %v1249_v58  ;;  %v1219_v3 = vmul.f32 %v2130_v0, %v1183_v42 }
 0x342   : > { %v1639_v26 = vpop.eup %1638  ;;  %1286 = vst [vmem:[%s2142_s21 + $0xd0] sm:$0xff] %v1254_v34  ;;  %v1216_v53 = vmul.f32 %v2130_v0, %v1180_v18 }
 0x343   : > { %v1641_v8 = vpop.eup %1640  ;;  %v1255_v12 = vadd.f32 %v2133_v50, %v1219_v3  ;;  %v1181_v21 = vmul.f32 %v1639_v26, %v2099_v38 }
 0x344   : > { %v1252_v35 = vadd.f32 %v2133_v50, %v1216_v53  ;;  %v1184_v61 = vmul.f32 %v1641_v8, %v2106_v63 }
 0x345   : > { %1287 = vst [vmem:[%s2142_s21 + $0xd8] sm:$0xff] %v1255_v12  ;;  %v1217_v46 = vmul.f32 %v2130_v0, %v1181_v21 }
 0x346   : > { %v1643_v60 = vpop.eup %1642  ;;  %1284 = vst [vmem:[%s2142_s21 + $0xc0] sm:$0xff] %v1252_v35  ;;  %v1220_v33 = vmul.f32 %v2130_v0, %v1184_v61 }
 0x347   : > { %v1645_v19 = vpop.eup %1644  ;;  %v1253_v2 = vadd.f32 %v2133_v50, %v1217_v46  ;;  %v1185_v38 = vmul.f32 %v1643_v60, %v2111_v5 }
 0x348   : > { %v1256_v24 = vadd.f32 %v2133_v50, %v1220_v33  ;;  %v1186_v59 = vmul.f32 %v1645_v19, %v2116_v13 }
 0x349   : > { %1285 = vst [vmem:[%s2142_s21 + $0xc8] sm:$0xff] %v1253_v2  ;;  %v1221_v63 = vmul.f32 %v2130_v0, %v1185_v38 }
 0x34a   : > { %v1647_v57 = vpop.eup %1646  ;;  %1288 = vst [vmem:[%s2142_s21 + $0xe0] sm:$0xff] %v1256_v24  ;;  %v1222_v29 = vmul.f32 %v2130_v0, %v1186_v59 }
 0x34b   : > { %v1257_v56 = vadd.f32 %v2133_v50, %v1221_v63  ;;  %v1187_v6 = vmul.f32 %v1647_v57, %v2121_v52 }
 0x34c   : > { %v1258_v17 = vadd.f32 %v2133_v50, %v1222_v29 }
 0x34d   : > { %1289 = vst [vmem:[%s2142_s21 + $0xe8] sm:$0xff] %v1257_v56  ;;  %v1223_v5 = vmul.f32 %v2130_v0, %v1187_v6 }
 0x34e   : > { %1290 = vst [vmem:[%s2142_s21 + $0xf0] sm:$0xff] %v1258_v17 }
 0x34f   : > { %v1259_v32 = vadd.f32 %v2133_v50, %v1223_v5 }
 0x351   : > { %1291 = vst [vmem:[%s2142_s21 + $0xf8] sm:$0xff] %v1259_v32 }
 0x352 PF: > { %s21_s23 = sadd.s32 1, %s1668_s23  }
 0x353   : > { %p18_p12 = scmp.ge.s32.totalorder %s21_s23, 8  }
 0x355   :  { %20 = sbr.rel (!%p18_p12) target bundleno = 16 (0x10), region = 75 }

</bundles_post_ra>
